<compile_context>
chip_gen: v7x
topology: tpu7x:2x2x1
jax: 0.10.0
libtpu: 0.0.40
codegen_flags: <defaults>
</compile_context>

<pallas_src>
import jax
import jax.numpy as jnp
from jax.experimental import pallas as pl
from jax.experimental.pallas import tpu as pltpu


def _lightconv_kernel(x_ref, halo_ref, w1_ref, wdw_ref, bias_ref, o_ref, xbuf_ref):
    # x_ref:    (1, TH, W, Cin)    one H-tile of one batch element (NHWC)
    # halo_ref: (1, 2, W, Cin)     row above / row below the tile (zero at image edge)
    # w1_ref:   (Cin, Cop)         1x1 conv weights (Cop = Cout padded to 128)
    # wdw_ref:  (3, 3, Cop)        depthwise 3x3 weights with BN scale folded in
    # bias_ref: (1, Cop)           folded BN bias
    # o_ref:    (1, TH, W, Cop)
    # xbuf_ref: (TH+2, W, Cin)     VMEM scratch: [top halo | tile rows | bottom halo]
    _, TH, W, Cin = x_ref.shape
    Cop = w1_ref.shape[1]
    R = TH + 2

    # Assemble the (TH+2)-row input window once in VMEM scratch (cheap Cin side).
    xbuf_ref[0] = halo_ref[0, 0]
    xbuf_ref[1:TH + 1] = x_ref[0]
    xbuf_ref[TH + 1] = halo_ref[0, 1]
    xfull = xbuf_ref[...]                                   # (R, W, Cin)

    # --- 1x1 conv == matmul over channels (MXU), incl. the 2 halo rows ---
    y2 = jnp.dot(
        xfull.reshape(R * W, Cin),
        w1_ref[...],
        preferred_element_type=jnp.float32,
    )                                                        # (R*W, Cop)

    # --- column (dj) shifts via XLU sublane rolls; wrapped entries masked ---
    # roll(+1):        out[i] = y2[i-1]  -> value at column c-1 (left neighbour)
    # roll(R*W - 1):   out[i] = y2[i+1]  -> value at column c+1 (right neighbour)
    l2 = pltpu.roll(y2, shift=1, axis=0)
    r2 = pltpu.roll(y2, shift=R * W - 1, axis=0)

    y = y2.reshape(R, W, Cop)
    yl = l2.reshape(R, W, Cop)
    yr = r2.reshape(R, W, Cop)

    col = jax.lax.broadcasted_iota(jnp.int32, (R, W, Cop), 1)
    yl = jnp.where(col > 0, yl, 0.0)        # column -1 is the zero pad
    yr = jnp.where(col < W - 1, yr, 0.0)    # column W  is the zero pad

    # --- depthwise 3x3 (padding=1): 9 taps = row slice (free) x column variant ---
    wdw = wdw_ref[...]                      # (3, 3, Cop); BN scale already folded
    taps = (yl, y, yr)                      # dj = 0, 1, 2  ->  c-1, c, c+1
    acc = y[1:TH + 1] * wdw[1, 1]           # init from the center tap (no zeros fill)
    for di in range(3):                     # static 3x3 taps, row shift via slice
        for dj in range(3):
            if di == 1 and dj == 1:
                continue
            acc = acc + taps[dj][di:di + TH] * wdw[di, dj]

    # --- folded BN bias + ReLU ---
    z = acc + bias_ref[...]                 # (1, Cop) broadcasts over (TH, W, Cop)
    o_ref[0] = jnp.maximum(z, 0.0).astype(o_ref.dtype)


def _pick_tile_h(H, block_h):
    """Largest divisor of H that is <= block_h (but not degenerately small)."""
    block_h = max(1, min(block_h, H))
    for th in range(block_h, 0, -1):
        if H % th == 0:
            if th >= max(2, block_h // 2) or th == H:
                return th
            break
    return H


def lightconv3x3_pallas_nhwc(x_nhwc, w1, wdw, gamma, beta, run_mean, run_var,
                             eps=1e-5, block_h=8):
    """x_nhwc: (N, H, W, Cin); w1: (Cout, Cin); wdw: (Cout, 3, 3). Returns NHWC."""
    N, H, W, Cin = x_nhwc.shape
    Cout = w1.shape[0]
    Cop = ((Cout + 127) // 128) * 128                 # lane-pad output channels
    th = _pick_tile_h(H, block_h)                     # H tile height
    nh = H // th
    R = th + 2
    f32 = jnp.float32

    x_nhwc = x_nhwc.astype(f32)
    # TODO(synk): on v6e/v7x, feeding the MXU bf16 x / w1 halves input DMA bytes
    # (keep f32 accumulation); kept f32 here to match the f32 reference exactly.

    # Fold BN (inference) into per-channel scale/bias; fold scale into dw weights.
    inv = (gamma / jnp.sqrt(run_var + eps)).astype(f32)
    bias = (beta - run_mean * inv).astype(f32)

    w1_k = jnp.zeros((Cin, Cop), f32).at[:, :Cout].set(
        jnp.transpose(w1, (1, 0)).astype(f32))
    wdw_k = jnp.zeros((3, 3, Cop), f32).at[:, :, :Cout].set(
        jnp.transpose(wdw, (1, 2, 0)).astype(f32) * inv[None, None, :])
    bias_k = jnp.zeros((1, Cop), f32).at[:, :Cout].set(bias[None, :])

    # Halo rows: for tile h, the row above is original row th*h - 1 (zero for the
    # first tile) and the row below is th*(h+1) (zero for the last tile).  Gathered
    # directly via strided slices -- no full-tensor jnp.pad materialization.
    zero_row = jnp.zeros((N, 1, W, Cin), f32)
    top = jnp.concatenate(
        [zero_row, x_nhwc[:, th - 1:th * (nh - 1):th]], axis=1)   # (N, nh, W, Cin)
    bot = jnp.concatenate(
        [x_nhwc[:, th:th * (nh - 1) + 1:th], zero_row], axis=1)   # (N, nh, W, Cin)
    halo = jnp.stack([top, bot], axis=2).reshape(N * nh, 2, W, Cin)

    flops = 2 * N * nh * R * W * Cin * Cop + 19 * N * H * W * Cop
    bytes_accessed = 4 * (x_nhwc.size + halo.size + w1_k.size + wdw_k.size
                          + bias_k.size + N * H * W * Cop)

    out = pl.pallas_call(
        _lightconv_kernel,
        out_shape=jax.ShapeDtypeStruct((N, H, W, Cop), f32),
        grid_spec=pltpu.PrefetchScalarGridSpec(
            num_scalar_prefetch=0,
            grid=(N, nh),
            in_specs=[
                pl.BlockSpec((1, th, W, Cin), lambda n, h: (n, h, 0, 0)),
                pl.BlockSpec((1, 2, W, Cin), lambda n, h: (n * nh + h, 0, 0, 0)),
                pl.BlockSpec((Cin, Cop), lambda n, h: (0, 0)),
                pl.BlockSpec((3, 3, Cop), lambda n, h: (0, 0, 0)),
                pl.BlockSpec((1, Cop), lambda n, h: (0, 0)),
            ],
            out_specs=pl.BlockSpec((1, th, W, Cop), lambda n, h: (n, h, 0, 0)),
            scratch_shapes=[pltpu.VMEM((R, W, Cin), f32)],
        ),
        compiler_params=pltpu.CompilerParams(
            dimension_semantics=("parallel", "parallel"),
            vmem_limit_bytes=32 * 1024 * 1024,
        ),
        cost_estimate=pl.CostEstimate(
            flops=flops, transcendentals=0, bytes_accessed=bytes_accessed),
    )(x_nhwc, halo, w1_k, wdw_k, bias_k)

    return out[..., :Cout]


def lightconv3x3_pallas(x_nchw, w1, wdw, gamma, beta, run_mean, run_var,
                        eps=1e-5, block_h=8):
    """NCHW wrapper matching the PyTorch module boundary.

    NOTE: an NHWC pipeline should call lightconv3x3_pallas_nhwc directly and
    skip these two full-tensor transposes (they cost about as much HBM traffic
    as the fused kernel itself).
    """
    x_nhwc = jnp.transpose(x_nchw, (0, 2, 3, 1))
    out = lightconv3x3_pallas_nhwc(x_nhwc, w1, wdw, gamma, beta,
                                   run_mean, run_var, eps, block_h)
    return jnp.transpose(out, (0, 3, 1, 2))


def lightconv3x3_ref(x_nchw, w1, wdw, gamma, beta, run_mean, run_var, eps=1e-5):
    """Pure-JAX reference (mirrors the PyTorch module in eval mode)."""
    Cout = w1.shape[0]
    y = jax.lax.conv_general_dilated(
        x_nchw, w1[:, :, None, None], (1, 1), "VALID",
        dimension_numbers=("NCHW", "OIHW", "NCHW"))
    y = jax.lax.conv_general_dilated(
        y, wdw[:, None, :, :], (1, 1), ((1, 1), (1, 1)),
        feature_group_count=Cout,
        dimension_numbers=("NCHW", "OIHW", "NCHW"))
    inv = gamma / jnp.sqrt(run_var + eps)
    y = y * inv[None, :, None, None] + (beta - run_mean * inv)[None, :, None, None]
    return jnp.maximum(y, 0.0)


if __name__ == "__main__":
    N, Cin, Cout, H, W = 2, 4, 8, 16, 16

    key = jax.random.PRNGKey(0)
    k1, k2, k3, k4, k5 = jax.random.split(key, 5)

    x = jax.random.normal(k1, (N, Cin, H, W), jnp.float32)
    w1 = jax.random.normal(k2, (Cout, Cin), jnp.float32) * 0.3    # conv1 (Cout,Cin,1,1)
    wdw = jax.random.normal(k3, (Cout, 3, 3), jnp.float32) * 0.3  # conv2 (Cout,1,3,3)
    gamma = 1.0 + 0.1 * jax.random.normal(k4, (Cout,), jnp.float32)
    beta = 0.1 * jax.random.normal(k5, (Cout,), jnp.float32)
    run_mean = jnp.linspace(-0.2, 0.2, Cout, dtype=jnp.float32)
    run_var = jnp.linspace(0.8, 1.2, Cout, dtype=jnp.float32)
    # BatchNorm is implemented in inference mode (running stats), the standard
    # semantics for a deployed forward pass.

    out = lightconv3x3_pallas(x, w1, wdw, gamma, beta, run_mean, run_var,
                              block_h=8)   # H=16, TH=8 -> 2 H-tiles: exercises halos
    out = jax.block_until_ready(out)

    ref = lightconv3x3_ref(x, w1, wdw, gamma, beta, run_mean, run_var)
    assert out.shape == (N, Cout, H, W)
    assert jnp.allclose(out, ref, atol=1e-4, rtol=1e-4), (
        f"max abs err {jnp.max(jnp.abs(out - ref))}")

    print("KERNEL_OK")
</pallas_src>

<mosaic_0001>
module attributes {stable_mosaic.version = 11 : i64} {
  func.func @_lightconv_kernel(%arg0: i32, %arg1: i32, %arg2: memref<1x8x16x4xf32, #tpu.memory_space<vmem>>, %arg3: memref<1x2x16x4xf32, #tpu.memory_space<vmem>>, %arg4: memref<4x128xf32, #tpu.memory_space<vmem>>, %arg5: memref<3x3x128xf32, #tpu.memory_space<vmem>>, %arg6: memref<1x128xf32, #tpu.memory_space<vmem>>, %arg7: memref<1x8x16x128xf32, #tpu.memory_space<vmem>>, %arg8: memref<10x16x4xf32, #tpu.memory_space<vmem>>) attributes {dimension_semantics = [#tpu.dimension_semantics<parallel>, #tpu.dimension_semantics<parallel>], iteration_bounds = array<i64: 2, 2>, scalar_prefetch = 0 : i64, scratch_operands = 1 : i64, tpu.core_type = #tpu.core_type<tc>, window_params = [{transform_indices = @transform_0, window_bounds = array<i64: 1, 8, 16, 4>}, {transform_indices = @transform_1, window_bounds = array<i64: 1, 2, 16, 4>}, {pipeline_mode = #tpu.pipeline_mode<synchronous>, transform_indices = @transform_2, window_bounds = array<i64: 4, 128>}, {pipeline_mode = #tpu.pipeline_mode<synchronous>, transform_indices = @transform_3, window_bounds = array<i64: 3, 3, 128>}, {pipeline_mode = #tpu.pipeline_mode<synchronous>, transform_indices = @transform_4, window_bounds = array<i64: 1, 128>}, {transform_indices = @transform_5, window_bounds = array<i64: 1, 8, 16, 128>}]} {
    %c0 = arith.constant 0 : index
    %c0_0 = arith.constant 0 : index
    %c0_1 = arith.constant 0 : index
    %c0_2 = arith.constant 0 : index
    %0 = vector.load %arg3[%c0, %c0_0, %c0_1, %c0_2] : memref<1x2x16x4xf32, #tpu.memory_space<vmem>>, vector<1x1x16x4xf32>
    %1 = vector.shape_cast %0 : vector<1x1x16x4xf32> to vector<16x4xf32>
    %c0_3 = arith.constant 0 : index
    %c0_4 = arith.constant 0 : index
    %c0_5 = arith.constant 0 : index
    %2 = vector.load %arg8[%c0_3, %c0_4, %c0_5] : memref<10x16x4xf32, #tpu.memory_space<vmem>>, vector<1x16x4xf32>
    %3 = vector.shape_cast %2 : vector<1x16x4xf32> to vector<16x4xf32>
    %4 = vector.shape_cast %1 : vector<16x4xf32> to vector<1x16x4xf32>
    tpu.vector_store %arg8[%c0_3, %c0_4, %c0_5], %4 {strides = array<i32>} : memref<10x16x4xf32, #tpu.memory_space<vmem>>, vector<1x16x4xf32>,
    %c0_6 = arith.constant 0 : index
    %c0_7 = arith.constant 0 : index
    %c0_8 = arith.constant 0 : index
    %c0_9 = arith.constant 0 : index
    %5 = vector.load %arg2[%c0_6, %c0_7, %c0_8, %c0_9] : memref<1x8x16x4xf32, #tpu.memory_space<vmem>>, vector<1x8x16x4xf32>
    %6 = vector.shape_cast %5 : vector<1x8x16x4xf32> to vector<8x16x4xf32>
    %c1 = arith.constant 1 : index
    %c0_10 = arith.constant 0 : index
    %c0_11 = arith.constant 0 : index
    %7 = vector.load %arg8[%c1, %c0_10, %c0_11] : memref<10x16x4xf32, #tpu.memory_space<vmem>>, vector<8x16x4xf32>
    tpu.vector_store %arg8[%c1, %c0_10, %c0_11], %6 {strides = array<i32>} : memref<10x16x4xf32, #tpu.memory_space<vmem>>, vector<8x16x4xf32>,
    %c0_12 = arith.constant 0 : index
    %c1_13 = arith.constant 1 : index
    %c0_14 = arith.constant 0 : index
    %c0_15 = arith.constant 0 : index
    %8 = vector.load %arg3[%c0_12, %c1_13, %c0_14, %c0_15] : memref<1x2x16x4xf32, #tpu.memory_space<vmem>>, vector<1x1x16x4xf32>
    %9 = vector.shape_cast %8 : vector<1x1x16x4xf32> to vector<16x4xf32>
    %c9 = arith.constant 9 : index
    %c0_16 = arith.constant 0 : index
    %c0_17 = arith.constant 0 : index
    %10 = vector.load %arg8[%c9, %c0_16, %c0_17] : memref<10x16x4xf32, #tpu.memory_space<vmem>>, vector<1x16x4xf32>
    %11 = vector.shape_cast %10 : vector<1x16x4xf32> to vector<16x4xf32>
    %12 = vector.shape_cast %9 : vector<16x4xf32> to vector<1x16x4xf32>
    tpu.vector_store %arg8[%c9, %c0_16, %c0_17], %12 {strides = array<i32>} : memref<10x16x4xf32, #tpu.memory_space<vmem>>, vector<1x16x4xf32>,
    %c0_18 = arith.constant 0 : index
    %c0_19 = arith.constant 0 : index
    %c0_20 = arith.constant 0 : index
    %13 = vector.load %arg8[%c0_18, %c0_19, %c0_20] : memref<10x16x4xf32, #tpu.memory_space<vmem>>, vector<10x16x4xf32>
    %14 = vector.shape_cast %13 : vector<10x16x4xf32> to vector<160x4xf32>
    %c0_21 = arith.constant 0 : index
    %c0_22 = arith.constant 0 : index
    %15 = vector.load %arg4[%c0_21, %c0_22] : memref<4x128xf32, #tpu.memory_space<vmem>>, vector<4x128xf32>
    %cst = arith.constant dense<0.000000e+00> : vector<160x128xf32>
    %16 = tpu.matmul %14, %15, %cst {dimension_numbers = #tpu.dot_dimension_numbers<[1], [0], [0], [1], [0, 0, 1, 1], [], []>} : vector<160x4xf32>, vector<4x128xf32>, vector<160x128xf32> -> vector<160x128xf32>
    %c1_i32 = arith.constant 1 : i32
    %17 = tpu.dynamic_rotate %16 by %c1_i32 dim 0 : vector<160x128xf32>, i32 -> vector<160x128xf32>
    %c159_i32 = arith.constant 159 : i32
    %18 = tpu.dynamic_rotate %16 by %c159_i32 dim 0 : vector<160x128xf32>, i32 -> vector<160x128xf32>
    %19 = vector.shape_cast %16 : vector<160x128xf32> to vector<10x16x128xf32>
    %20 = vector.shape_cast %17 : vector<160x128xf32> to vector<10x16x128xf32>
    %21 = vector.shape_cast %18 : vector<160x128xf32> to vector<10x16x128xf32>
    %22 = tpu.iota {dimensions = array<i32: 1>} : vector<10x16x128xi32>
    %c0_i32 = arith.constant 0 : i32
    %23 = vector.broadcast %c0_i32 : i32 to vector<10x16x128xi32>
    %24 = arith.cmpi sgt, %22, %23 : vector<10x16x128xi32>
    %cst_23 = arith.constant 0.000000e+00 : f32
    %25 = vector.broadcast %cst_23 : f32 to vector<10x16x128xf32>
    %26 = arith.select %24, %20, %25 : vector<10x16x128xi1>, vector<10x16x128xf32>
    %c15_i32 = arith.constant 15 : i32
    %27 = vector.broadcast %c15_i32 : i32 to vector<10x16x128xi32>
    %28 = arith.cmpi slt, %22, %27 : vector<10x16x128xi32>
    %cst_24 = arith.constant 0.000000e+00 : f32
    %29 = vector.broadcast %cst_24 : f32 to vector<10x16x128xf32>
    %30 = arith.select %28, %21, %29 : vector<10x16x128xi1>, vector<10x16x128xf32>
    %c0_25 = arith.constant 0 : index
    %c0_26 = arith.constant 0 : index
    %c0_27 = arith.constant 0 : index
    %31 = vector.load %arg5[%c0_25, %c0_26, %c0_27] : memref<3x3x128xf32, #tpu.memory_space<vmem>>, vector<3x3x128xf32>
    %32 = vector.extract_strided_slice %19 {offsets = [1, 0, 0], sizes = [8, 16, 128], strides = [1, 1, 1]} : vector<10x16x128xf32> to vector<8x16x128xf32>
    %33 = vector.extract_strided_slice %31 {offsets = [1, 1, 0], sizes = [1, 1, 128], strides = [1, 1, 1]} : vector<3x3x128xf32> to vector<1x1x128xf32>
    %34 = vector.shape_cast %33 : vector<1x1x128xf32> to vector<128xf32>
    %35 = vector.shape_cast %34 : vector<128xf32> to vector<1x1x128xf32>
    %36 = vector.broadcast %35 : vector<1x1x128xf32> to vector<8x16x128xf32>
    %37 = arith.mulf %32, %36 : vector<8x16x128xf32>
    %38 = vector.extract_strided_slice %26 {offsets = [0, 0, 0], sizes = [8, 16, 128], strides = [1, 1, 1]} : vector<10x16x128xf32> to vector<8x16x128xf32>
    %39 = vector.extract_strided_slice %31 {offsets = [0, 0, 0], sizes = [1, 1, 128], strides = [1, 1, 1]} : vector<3x3x128xf32> to vector<1x1x128xf32>
    %40 = vector.shape_cast %39 : vector<1x1x128xf32> to vector<128xf32>
    %41 = vector.shape_cast %40 : vector<128xf32> to vector<1x1x128xf32>
    %42 = vector.broadcast %41 : vector<1x1x128xf32> to vector<8x16x128xf32>
    %43 = arith.mulf %38, %42 : vector<8x16x128xf32>
    %44 = arith.addf %37, %43 : vector<8x16x128xf32>
    %45 = vector.extract_strided_slice %19 {offsets = [0, 0, 0], sizes = [8, 16, 128], strides = [1, 1, 1]} : vector<10x16x128xf32> to vector<8x16x128xf32>
    %46 = vector.extract_strided_slice %31 {offsets = [0, 1, 0], sizes = [1, 1, 128], strides = [1, 1, 1]} : vector<3x3x128xf32> to vector<1x1x128xf32>
    %47 = vector.shape_cast %46 : vector<1x1x128xf32> to vector<128xf32>
    %48 = vector.shape_cast %47 : vector<128xf32> to vector<1x1x128xf32>
    %49 = vector.broadcast %48 : vector<1x1x128xf32> to vector<8x16x128xf32>
    %50 = arith.mulf %45, %49 : vector<8x16x128xf32>
    %51 = arith.addf %44, %50 : vector<8x16x128xf32>
    %52 = vector.extract_strided_slice %30 {offsets = [0, 0, 0], sizes = [8, 16, 128], strides = [1, 1, 1]} : vector<10x16x128xf32> to vector<8x16x128xf32>
    %53 = vector.extract_strided_slice %31 {offsets = [0, 2, 0], sizes = [1, 1, 128], strides = [1, 1, 1]} : vector<3x3x128xf32> to vector<1x1x128xf32>
    %54 = vector.shape_cast %53 : vector<1x1x128xf32> to vector<128xf32>
    %55 = vector.shape_cast %54 : vector<128xf32> to vector<1x1x128xf32>
    %56 = vector.broadcast %55 : vector<1x1x128xf32> to vector<8x16x128xf32>
    %57 = arith.mulf %52, %56 : vector<8x16x128xf32>
    %58 = arith.addf %51, %57 : vector<8x16x128xf32>
    %59 = vector.extract_strided_slice %26 {offsets = [1, 0, 0], sizes = [8, 16, 128], strides = [1, 1, 1]} : vector<10x16x128xf32> to vector<8x16x128xf32>
    %60 = vector.extract_strided_slice %31 {offsets = [1, 0, 0], sizes = [1, 1, 128], strides = [1, 1, 1]} : vector<3x3x128xf32> to vector<1x1x128xf32>
    %61 = vector.shape_cast %60 : vector<1x1x128xf32> to vector<128xf32>
    %62 = vector.shape_cast %61 : vector<128xf32> to vector<1x1x128xf32>
    %63 = vector.broadcast %62 : vector<1x1x128xf32> to vector<8x16x128xf32>
    %64 = arith.mulf %59, %63 : vector<8x16x128xf32>
    %65 = arith.addf %58, %64 : vector<8x16x128xf32>
    %66 = vector.extract_strided_slice %30 {offsets = [1, 0, 0], sizes = [8, 16, 128], strides = [1, 1, 1]} : vector<10x16x128xf32> to vector<8x16x128xf32>
    %67 = vector.extract_strided_slice %31 {offsets = [1, 2, 0], sizes = [1, 1, 128], strides = [1, 1, 1]} : vector<3x3x128xf32> to vector<1x1x128xf32>
    %68 = vector.shape_cast %67 : vector<1x1x128xf32> to vector<128xf32>
    %69 = vector.shape_cast %68 : vector<128xf32> to vector<1x1x128xf32>
    %70 = vector.broadcast %69 : vector<1x1x128xf32> to vector<8x16x128xf32>
    %71 = arith.mulf %66, %70 : vector<8x16x128xf32>
    %72 = arith.addf %65, %71 : vector<8x16x128xf32>
    %73 = vector.extract_strided_slice %26 {offsets = [2, 0, 0], sizes = [8, 16, 128], strides = [1, 1, 1]} : vector<10x16x128xf32> to vector<8x16x128xf32>
    %74 = vector.extract_strided_slice %31 {offsets = [2, 0, 0], sizes = [1, 1, 128], strides = [1, 1, 1]} : vector<3x3x128xf32> to vector<1x1x128xf32>
    %75 = vector.shape_cast %74 : vector<1x1x128xf32> to vector<128xf32>
    %76 = vector.shape_cast %75 : vector<128xf32> to vector<1x1x128xf32>
    %77 = vector.broadcast %76 : vector<1x1x128xf32> to vector<8x16x128xf32>
    %78 = arith.mulf %73, %77 : vector<8x16x128xf32>
    %79 = arith.addf %72, %78 : vector<8x16x128xf32>
    %80 = vector.extract_strided_slice %19 {offsets = [2, 0, 0], sizes = [8, 16, 128], strides = [1, 1, 1]} : vector<10x16x128xf32> to vector<8x16x128xf32>
    %81 = vector.extract_strided_slice %31 {offsets = [2, 1, 0], sizes = [1, 1, 128], strides = [1, 1, 1]} : vector<3x3x128xf32> to vector<1x1x128xf32>
    %82 = vector.shape_cast %81 : vector<1x1x128xf32> to vector<128xf32>
    %83 = vector.shape_cast %82 : vector<128xf32> to vector<1x1x128xf32>
    %84 = vector.broadcast %83 : vector<1x1x128xf32> to vector<8x16x128xf32>
    %85 = arith.mulf %80, %84 : vector<8x16x128xf32>
    %86 = arith.addf %79, %85 : vector<8x16x128xf32>
    %87 = vector.extract_strided_slice %30 {offsets = [2, 0, 0], sizes = [8, 16, 128], strides = [1, 1, 1]} : vector<10x16x128xf32> to vector<8x16x128xf32>
    %88 = vector.extract_strided_slice %31 {offsets = [2, 2, 0], sizes = [1, 1, 128], strides = [1, 1, 1]} : vector<3x3x128xf32> to vector<1x1x128xf32>
    %89 = vector.shape_cast %88 : vector<1x1x128xf32> to vector<128xf32>
    %90 = vector.shape_cast %89 : vector<128xf32> to vector<1x1x128xf32>
    %91 = vector.broadcast %90 : vector<1x1x128xf32> to vector<8x16x128xf32>
    %92 = arith.mulf %87, %91 : vector<8x16x128xf32>
    %93 = arith.addf %86, %92 : vector<8x16x128xf32>
    %c0_28 = arith.constant 0 : index
    %c0_29 = arith.constant 0 : index
    %94 = vector.load %arg6[%c0_28, %c0_29] : memref<1x128xf32, #tpu.memory_space<vmem>>, vector<1x128xf32>
    %95 = vector.shape_cast %94 : vector<1x128xf32> to vector<1x1x128xf32>
    %96 = vector.broadcast %95 : vector<1x1x128xf32> to vector<8x16x128xf32>
    %97 = arith.addf %93, %96 : vector<8x16x128xf32>
    %cst_30 = arith.constant 0.000000e+00 : f32
    %98 = vector.broadcast %cst_30 : f32 to vector<8x16x128xf32>
    %99 = arith.maximumf %97, %98 : vector<8x16x128xf32>
    %c0_31 = arith.constant 0 : index
    %c0_32 = arith.constant 0 : index
    %c0_33 = arith.constant 0 : index
    %c0_34 = arith.constant 0 : index
    %100 = vector.load %arg7[%c0_31, %c0_32, %c0_33, %c0_34] : memref<1x8x16x128xf32, #tpu.memory_space<vmem>>, vector<1x8x16x128xf32>
    %101 = vector.shape_cast %100 : vector<1x8x16x128xf32> to vector<8x16x128xf32>
    %102 = vector.shape_cast %99 : vector<8x16x128xf32> to vector<1x8x16x128xf32>
    tpu.vector_store %arg7[%c0_31, %c0_32, %c0_33, %c0_34], %102 {strides = array<i32>} : memref<1x8x16x128xf32, #tpu.memory_space<vmem>>, vector<1x8x16x128xf32>,
    return
  }
  func.func @transform_0(%arg0: i32, %arg1: i32) -> (i32, i32, i32, i32) {
    %c0_i32 = arith.constant 0 : i32
    %c0_i32_0 = arith.constant 0 : i32
    %c0_i32_1 = arith.constant 0 : i32
    return %arg0, %arg1, %c0_i32, %c0_i32_0 : i32, i32, i32, i32
  }
  func.func @transform_1(%arg0: i32, %arg1: i32) -> (i32, i32, i32, i32) {
    %c2_i32 = arith.constant 2 : i32
    %0 = arith.muli %arg0, %c2_i32 : i32
    %1 = arith.addi %0, %arg1 : i32
    %c0_i32 = arith.constant 0 : i32
    %c0_i32_0 = arith.constant 0 : i32
    %c0_i32_1 = arith.constant 0 : i32
    %c0_i32_2 = arith.constant 0 : i32
    return %1, %c0_i32, %c0_i32_0, %c0_i32_1 : i32, i32, i32, i32
  }
  func.func @transform_2(%arg0: i32, %arg1: i32) -> (i32, i32) {
    %c0_i32 = arith.constant 0 : i32
    %c0_i32_0 = arith.constant 0 : i32
    %c0_i32_1 = arith.constant 0 : i32
    return %c0_i32, %c0_i32_0 : i32, i32
  }
  func.func @transform_3(%arg0: i32, %arg1: i32) -> (i32, i32, i32) {
    %c0_i32 = arith.constant 0 : i32
    %c0_i32_0 = arith.constant 0 : i32
    %c0_i32_1 = arith.constant 0 : i32
    %c0_i32_2 = arith.constant 0 : i32
    return %c0_i32, %c0_i32_0, %c0_i32_1 : i32, i32, i32
  }
  func.func @transform_4(%arg0: i32, %arg1: i32) -> (i32, i32) {
    %c0_i32 = arith.constant 0 : i32
    %c0_i32_0 = arith.constant 0 : i32
    %c0_i32_1 = arith.constant 0 : i32
    return %c0_i32, %c0_i32_0 : i32, i32
  }
  func.func @transform_5(%arg0: i32, %arg1: i32) -> (i32, i32, i32, i32) {
    %c0_i32 = arith.constant 0 : i32
    %c0_i32_0 = arith.constant 0 : i32
    %c0_i32_1 = arith.constant 0 : i32
    return %arg0, %arg1, %c0_i32, %c0_i32_0 : i32, i32, i32, i32
  }
}

</mosaic_0001>

<bundles_post_ra>
// kernel: tpu_custom_call.1
= control target key start
LH: loop header
LB: loop body
LE: loop exit
PB: predicated region body
PF: predicated region fallthrough
CT: control target
= control target key end

     0   :  { %10 = vsyncpa [#allocation4], 0  ;;  %s2464_s0 = inlined_call_operand.vmem [shape: f32[2,16,16,4], index: 0, kind: input, shape index: {}]   ;;  %s2465_s1 = inlined_call_operand.vmem [shape: f32[4,2,16,4], index: 1, kind: input, shape index: {}]   ;;  %s2466_s2 = inlined_call_operand.vmem [shape: f32[4,128], index: 2, kind: input, shape index: {}]   ;;  %s2467_s3 = inlined_call_operand.vmem [shape: f32[3,3,128], index: 3, kind: input, shape index: {}]   ;;  %s2468_s4 = inlined_call_operand.vmem [shape: f32[1,128], index: 4, kind: input, shape index: {}]   ;;  %s2469_s5 = inlined_call_operand.hbm [shape: f32[2,16,16,128], index: 5, kind: output, shape index: {}]  }
   0x1   :  { %12 = vsyncpa [#allocation4 + $0x1], 0  ;;  %s1499_s18 = smov 0   ;;  %s1501_s19 = smov 0  }
   0x2   :  { %s1503_s20 = smov 0   ;;  %s1505_s21 = smov 0  }
   0x3   :  { %s1507_s22 = smov 0   ;;  %s1509_s23 = smov 0  }
   0x4   :  { %s1511_s24 = smov 0   ;;  %s1513_s25 = smov 0  }
   0x5 LB: > { %s1194_s26 = sadd.s32 4294967295, %s1464_s25   ;;  %s1195_s27 = sadd.s32 4294967294, %s1464_s25   ;;  %s1464_s25 = sphi %s1513_s25, %s18_s25   ;;  %s1460_s24 = sphi %s1511_s24, %s2581_s24   ;;  %s1456_s23 = sphi %s1509_s23, %s2580_s23   ;;  %s1452_s22 = sphi %s1507_s22, %s2579_s22   ;;  %s1448_s21 = sphi %s1505_s21, %s2578_s21   ;;  %s1444_s20 = sphi %s1503_s20, %s2577_s20   ;;  %s1440_s19 = sphi %s1501_s19, %s2576_s19   ;;  %s1436_s18 = sphi %s1499_s18, %s2575_s18  }
   0x6   : > { %s27_s28 = sadd.s32 1, %s1456_s23  ;;  %s30_s29 = sadd.s32 1, %s1460_s24 }
   0x7   : > { %p28_p0 = scmp.ge.s32.totalorder %s27_s28, 2  ;;  %p170_p1 = scmp.ne.s32.totalorder %s1444_s20, %s1440_s19 }
   0x8   : > { %p171_p2 = scmp.eq.s32.totalorder %s1194_s26, 3  ;;  %p176_p5 = scmp.ne.s32.totalorder %s1440_s19, %s1436_s18 }
   0x9   : > { %s2583_s28 = smov (%p28_p0, %s27_s28), 0  ;;  %s2585_s29 = smov (!%p28_p0, %s30_s29), %s1460_s24 }
   0xa   : > { %s156_s30 = ssub.s32 %s1456_s23, %s2583_s28  ;;  %p1550_p3 = por %p171_p2, %p170_p1 }
   0xb   : > { %p32_p4 = scmp.ge.s32.totalorder %s2585_s29, 2  ;;  %p177_p6 = scmp.eq.s32.totalorder %s1195_s27, 3 }
   0xc   : > { %p1200_p7 = scmp.ge.s32.totalorder %s1464_s25, 1  ;;  %p230_p9 = scmp.lt.s32.totalorder %s1464_s25, 5 }
   0xd   : > { %s2587_s29 = smov (%p32_p4, %s2585_s29), 0  ;;  %p1559_p8 = por %p177_p6, %p176_p5 }
   0xe   : > { %s155_s8 = ssub.s32 %s1460_s24, %s2587_s29  ;;  %s160_s9 = sadd.s32 1, %s1444_s20 }
   0xf   : > { %s157_s10 = sor.u32 %s156_s30, %s155_s8  ;;  %p231_p10 = pnand %p1200_p7, %p230_p9 }
  0x10   : > { %p158_p11 = scmp.eq.s32.totalorder %s157_s10, 0 }
  0x11   : > { %234 = sbr.rel (%p231_p10) target bundleno = 382 (0x17e), region = 40 }
  0x12   : > { %s1568_s11 = scalar_select %p158_p11, %s1444_s20, %s160_s9  }
  0x18   : > { %v355_v0 = vld [vmem:[%s2466_s2] sm:$0xf]  ;;  %vm416_vm0 = vcmask 1043456   ;;  %s1206_s14 = sshll.u32 %s1452_s22, 1  ;;  %s1202_s15 = sshll.u32 %s1448_s21, 3  ;;  %vm293_vm1 = vcmask 31744   ;;  %v605_v41 = vlaneseq }
  0x19   : > { %1263 = vmatprep.subr.msk.mxu0 %vm416_vm0, %v355_v0  ;;  %1295 = vmatprep.subr.msk.mxu1 %vm416_vm0, %v355_v0  ;;  %s282_s16 = sadd.s32 %s1448_s21, %s1206_s14  ;;  %p271_p12 = scmp.lt.s32.totalorder %s1452_s22, 1  ;;  %v714_v47 = vld [vmem:[%s2467_s3] sm:$0x7]  ;;  %v715_v48 = vld [vmem:[%s2467_s3 + $0x4] sm:$0x7] }
  0x1a   : > { %1264 = vmatpush3.msk.msra.mxu0 %vm416_vm0, %v355_v0  ;;  %p283_p13 = scmp.lt.s32.totalorder %s282_s16, 3  ;;  %1296 = vmatpush3.msk.msra.mxu1 %vm416_vm0, %v355_v0  ;;  %p273_p0 = scmp.lt.s32.totalorder %s1202_s15, 15  ;;  %v1642_v42 = vshrl.u32 %v605_v41, 7  ;;  %v716_v55 = vld [vmem:[%s2467_s3 + $0x8] sm:$0x7] }
  0x1b   : > { %s272_s17 = scalar_select %p271_p12, %s1452_s22, 1 }
  0x1c   : > { %s2589_s16 = smov (!%p283_p13, %s282_s16), 3  ;;  %s2591_s15 = smov (!%p273_p0, %s1202_s15), 15  ;;  %v739_v43 = vsub.s32 0, %v1642_v42  ;;  %v719_v44 = vsub.s32 1, %v1642_v42  ;;  %v811_v45 = vsub.s32 2, %v1642_v42  ;;  %vm607_vm2 = vcmp.lt.s32.totalorder %v1642_v42, 1 }
  0x1d   : > { %s1240_s26 = sshll.u32 %s2589_s16, 5  ;;  %s1204_s27 = sshll.u32 %s272_s17, 5  ;;  %vm648_vm3 = vcmp.lt.s32.totalorder %v1642_v42, 7  ;;  %v1677_v60 = vadd.s32 8, %v1642_v42  ;;  %vm670_vm4 = vcmp.gt.s32.totalorder %v1642_v42, 0 }
  0x1e   : > { %s287_s9 = scalar_lea.vmem %s2465_s1, %s1240_s26  ;;  %s1203_s10 = sshll.u32 %s2591_s15, 1  ;;  %v1661_v52 = vrot.slane %v714_v47, %v739_v43  ;;  %v1668_v56 = vrot.slane %v714_v47, %v719_v44  ;;  %v1670_v57 = vrot.slane %v714_v47, %v811_v45  ;;  %v1674_v59 = vrot.slane %v715_v48, %v719_v44 }
  0x1f   : > { %v291_v1 = vld [vmem:[%s287_s9] sm:$0xff]  ;;  %v292_v2 = vld [vmem:[%s287_s9 + $0x8] sm:$0xff]  ;;  %s277_s12 = sadd.s32 %s1204_s27, %s1203_s10  ;;  %v1209_v3 = vld [vmem:[%s287_s9 + $0x10] sm:$0xff]  ;;  %vm693_vm5 = vcmp.lt.s32.totalorder %v1677_v60, 15  ;;  %s267_s10 = sand.u32 1, %s1440_s19  }
  0x20   : > { %294 = vst.msk [vmem:[#allocation2] sm:$0xff] %vm293_vm1, %v291_v1  ;;  %295 = vst.msk [vmem:[#allocation2 + $0x8] sm:$0xff] %vm293_vm1, %v292_v2  ;;  %s1205_s13 = sshll.u32 %s277_s12, 3  ;;  %v1210_v4 = vld [vmem:[%s287_s9 + $0x18] sm:$0xff]  ;;  %s1201_s14 = sshll.u32 %s267_s10, 7 }
  0x21   : > { %333 = vst.msk [vmem:[#allocation2 + $0x90] sm:$0xff] %vm293_vm1, %v1209_v3  ;;  %s1587_s17 = scalar_lea.vmem %s2464_s0, %s1205_s13  ;;  %334 = vst.msk [vmem:[#allocation2 + $0x98] sm:$0xff] %vm293_vm1, %v1210_v4  ;;  %v1697_v3 = vrot.slane %v715_v48, %v739_v43  ;;  %v1699_v4 = vrot.slane %v715_v48, %v811_v45  ;;  %s2137_s16 = scalar_lea.vmem [#allocation3], %s1201_s14 }
  0x22   : > { %v304_v5 = vld [vmem:[%s1587_s17 + $0x40] sm:$0xff]  ;;  %v305_v6 = vld [vmem:[%s1587_s17 + $0x48] sm:$0xff]  ;;  %v306_v9 = vld [vmem:[%s1587_s17 + $0x50] sm:$0xff]  ;;  %s1236_s15 = sshll.u32 %s1452_s22, 5  ;;  %s1097_s22 = sshll.u32 %s2137_s16, 4  ;;  %s2407_s22 = int_to_ptr.vmem [resolvable:$true] %s1097_s22 }
  0x23   : > { %v296_v7 = vld [vmem:[%s1587_s17] sm:$0xff]  ;;  %321 = vst.msk [vmem:[#allocation2 + $0x50] sm:$0xff] %vm293_vm1, %v304_v5  ;;  %322 = vst.msk [vmem:[#allocation2 + $0x58] sm:$0xff] %vm293_vm1, %v305_v6  ;;  %v297_v8 = vld [vmem:[%s1587_s17 + $0x8] sm:$0xff]  ;;  %v1701_v5 = vrot.slane %v716_v55, %v739_v43  ;;  %v1703_v6 = vrot.slane %v716_v55, %v719_v44  ;;  %s2412_s9 = scalar_lea.sflag [#allocation4], %s267_s10  ;;  %s1370_s12 = scalar_lea.vmem %s2407_s22, 2048 }
  0x24   : > { %313 = vst.msk [vmem:[#allocation2 + $0x10] sm:$0xff] %vm293_vm1, %v296_v7  ;;  %v307_v10 = vld [vmem:[%s1587_s17 + $0x58] sm:$0xff]  ;;  %314 = vst.msk [vmem:[#allocation2 + $0x18] sm:$0xff] %vm293_vm1, %v297_v8  ;;  %v298_v11 = vld [vmem:[%s1587_s17 + $0x10] sm:$0xff]  ;;  %p1371_p1 = scmp.ne.s32.totalorder %s2407_s22, %s1370_s12  ;;  %s1466_s13 = smov [#allocation3]  }
  0x25   : > { %323 = vst.msk [vmem:[#allocation2 + $0x60] sm:$0xff] %vm293_vm1, %v306_v9  ;;  %324 = vst.msk [vmem:[#allocation2 + $0x68] sm:$0xff] %vm293_vm1, %v307_v10  ;;  %v299_v12 = vld [vmem:[%s1587_s17 + $0x18] sm:$0xff]  ;;  %v308_v13 = vld [vmem:[%s1587_s17 + $0x60] sm:$0xff]  ;;  %v1708_v9 = vrot.slane %v716_v55, %v811_v45  ;;  %s1374_s14 = sshll.u32 %s1466_s13, 4  ;;  %s1375_s14 = int_to_ptr.vmem [resolvable:$false] %s1374_s14 }
  0x26   : > { %315 = vst.msk [vmem:[#allocation2 + $0x20] sm:$0xff] %vm293_vm1, %v298_v11  ;;  %316 = vst.msk [vmem:[#allocation2 + $0x28] sm:$0xff] %vm293_vm1, %v299_v12  ;;  %v309_v14 = vld [vmem:[%s1587_s17 + $0x68] sm:$0xff]  ;;  %v300_v15 = vld [vmem:[%s1587_s17 + $0x20] sm:$0xff]  ;;  %p1372_p2 = pnand %p1371_p1, %p1550_p3  ;;  %p1377_p5 = scmp.lt.s32.totalorder %s2407_s22, %s1375_s14 }
  0x27   : > { %325 = vst.msk [vmem:[#allocation2 + $0x70] sm:$0xff] %vm293_vm1, %v308_v13  ;;  %v301_v16 = vld [vmem:[%s1587_s17 + $0x28] sm:$0xff]  ;;  %326 = vst.msk [vmem:[#allocation2 + $0x78] sm:$0xff] %vm293_vm1, %v309_v14  ;;  %v310_v17 = vld [vmem:[%s1587_s17 + $0x70] sm:$0xff] }
  0x28   : > { %317 = vst.msk [vmem:[#allocation2 + $0x30] sm:$0xff] %vm293_vm1, %v300_v15  ;;  %318 = vst.msk [vmem:[#allocation2 + $0x38] sm:$0xff] %vm293_vm1, %v301_v16  ;;  %v311_v18 = vld [vmem:[%s1587_s17 + $0x78] sm:$0xff]  ;;  %v302_v19 = vld [vmem:[%s1587_s17 + $0x30] sm:$0xff]  ;;  %p1373_p4 = pneg %p1372_p2 }
  0x29   : > { %v335_v20 = vld [vmem:[#allocation2] sm:$0xff]  ;;  %v336_v21 = vld [vmem:[#allocation2 + $0x8] sm:$0xff]  ;;  %327 = vst.msk [vmem:[#allocation2 + $0x80] sm:$0xff] %vm293_vm1, %v310_v17  ;;  %328 = vst.msk [vmem:[#allocation2 + $0x88] sm:$0xff] %vm293_vm1, %v311_v18 }
  0x2a   : > { %319 = vst.msk [vmem:[#allocation2 + $0x40] sm:$0xff] %vm293_vm1, %v302_v19  ;;  %v303_v22 = vld [vmem:[%s1587_s17 + $0x38] sm:$0xff]  ;;  %1265 = vmatprep.mubr.msk.f32.mxu0 %vm293_vm1, %v335_v20  ;;  %v345_v23 = vld [vmem:[#allocation2 + $0x50] sm:$0xff]  ;;  %s1241_s17 = sshll.u32 %s1448_s21, 4 }
  0x2b   : > { %320 = vst.msk [vmem:[#allocation2 + $0x48] sm:$0xff] %vm293_vm1, %v303_v22  ;;  %1266 = vmatmul.mubr.msk.f32.vlgmr.msra.gmra.mrb[0].mxu0 %vm293_vm1, %v336_v21  ;;  %v346_v24 = vld [vmem:[#allocation2 + $0x58] sm:$0xff]  ;;  %v337_v25 = vld [vmem:[#allocation2 + $0x10] sm:$0xff]  ;;  %1280 = vmatprep.mubr.msk.f32.mxu1 %vm293_vm1, %v345_v23  ;;  %s1094_s26 = sadd.s32 %s1241_s17, %s1236_s15  ;;  %s1376_s17 = scalar_lea.vmem %s1375_s14, 4096 }
  0x2c   : > { %1268 = vmatprep.mubr.msk.f32.mxu0 %vm293_vm1, %v337_v25  ;;  %v338_v26 = vld [vmem:[#allocation2 + $0x18] sm:$0xff]  ;;  %v347_v27 = vld [vmem:[#allocation2 + $0x60] sm:$0xff]  ;;  %1281 = vmatmul.mubr.msk.f32.vlgmr.msra.gmra.mrb[0].mxu1 %vm293_vm1, %v346_v24  ;;  %v348_v29 = vld [vmem:[#allocation2 + $0x68] sm:$0xff]  ;;  %s1237_s21 = sshll.u32 %s1094_s26, 7  ;;  %p1378_p6 = scmp.lt.s32.totalorder %s1376_s17, %s1370_s12 }
  0x2d   : > { %v339_v28 = vld [vmem:[#allocation2 + $0x20] sm:$0xff]  ;;  %1283 = vmatprep.mubr.msk.f32.mxu1 %vm293_vm1, %v347_v27  ;;  %v340_v30 = vld [vmem:[#allocation2 + $0x28] sm:$0xff]  ;;  %v353_v39 = vld [vmem:[#allocation2 + $0x90] sm:$0xff]  ;;  %s2405_s8 = scalar_lea.hbm %s2469_s5, %s1237_s21 }
  0x2e   : > { %v349_v31 = vld [vmem:[#allocation2 + $0x70] sm:$0xff]  ;;  %v350_v33 = vld [vmem:[#allocation2 + $0x78] sm:$0xff]  ;;  %p1379_p7 = por %p1378_p6, %p1377_p5 }
  0x2f   : > { %1269 = vmatmul.mubr.msk.f32.gmra.mrb[2].mxu0 %vm293_vm1, %v338_v26  ;;  %v341_v32 = vld [vmem:[#allocation2 + $0x30] sm:$0xff]  ;;  %v342_v34 = vld [vmem:[#allocation2 + $0x38] sm:$0xff] }
  0x30   : > { %1271 = vmatprep.mubr.msk.f32.mxu0 %vm293_vm1, %v339_v28  ;;  %1284 = vmatmul.mubr.msk.f32.gmra.mrb[2].mxu1 %vm293_vm1, %v348_v29  ;;  %v351_v35 = vld [vmem:[#allocation2 + $0x80] sm:$0xff]  ;;  %v352_v37 = vld [vmem:[#allocation2 + $0x88] sm:$0xff]  ;;  %v354_v40 = vld [vmem:[#allocation2 + $0x98] sm:$0xff]  ;;  %p1380_p9 = pnand %p1379_p7, %p1373_p4 }
  0x31   : > { %1286 = vmatprep.mubr.msk.f32.mxu1 %vm293_vm1, %v349_v31  ;;  %v343_v36 = vld [vmem:[#allocation2 + $0x40] sm:$0xff] }
  0x32   : > { %v344_v38 = vld [vmem:[#allocation2 + $0x48] sm:$0xff] }
  0x33   : > { %1272 = vmatmul.mubr.msk.f32.gmra.mrb[4].mxu0 %vm293_vm1, %v340_v30 }
  0x34   : > { %1274 = vmatprep.mubr.msk.f32.mxu0 %vm293_vm1, %v341_v32  ;;  %1287 = vmatmul.mubr.msk.f32.gmra.mrb[4].mxu1 %vm293_vm1, %v350_v33 }
  0x35   : > { %1289 = vmatprep.mubr.msk.f32.mxu1 %vm293_vm1, %v351_v35 }
  0x37   : > { %1275 = vmatmul.mubr.msk.f32.gmra.mrb[6].mxu0 %vm293_vm1, %v342_v34 }
  0x38   : > { %1277 = vmatprep.mubr.msk.f32.mxu0 %vm293_vm1, %v343_v36  ;;  %1290 = vmatmul.mubr.msk.f32.gmra.mrb[6].mxu1 %vm293_vm1, %v352_v37 }
  0x39   : > { %1292 = vmatprep.mubr.msk.f32.mxu1 %vm293_vm1, %v353_v39 }
  0x3b   : > { %1278 = vmatmul.mubr.msk.f32.gmra.mrb[8].mxu0 %vm293_vm1, %v344_v38 }
  0x3c   : > { %1293 = vmatmul.mubr.msk.f32.gmra.mrb[8].mxu1 %vm293_vm1, %v354_v40 }
  0xfe   : > { %v1647_v46 = vpop.f32.mrb[0].mxu0 }
  0xff   : > { %v586_v49 = vrot.slane %v1647_v46, 7  ;;  %v629_v50 = vrot.slane %v1647_v46, 1  ;;  %v1657_v51 = vpop.f32.mrb[1].mxu0  ;;  %v1672_v58 = vpop.f32.mrb[0].mxu1  ;;  %v778_v12 = vmul.f32 %v1647_v46, %v1668_v56 }
 0x100   : > { %2493 = vst [vmem:[#allocation6_spill] sm:$0xff] %v1657_v51  ;;  %v2471_v53 = vrot.slane %v1657_v51, 7  ;;  %v2470_v54 = vrot.slane %v1657_v51, 1  ;;  %v596_v63 = vrot.slane %v1672_v58, 7  ;;  %v639_v0 = vrot.slane %v1672_v58, 1  ;;  %v1693_v1 = vpop.f32.mrb[1].mxu1 }
 0x101   : > { %v2473_v10 = vrot.slane %v1693_v1, 7  ;;  %v2472_v11 = vrot.slane %v1693_v1, 1  ;;  %v1740_v21 = vmul.f32 %v1668_v56, %v1657_v51  ;;  %v1744_v22 = vmul.f32 %v1672_v58, %v1674_v59 }
 0x102   : > { %v626_v61 = vsel %vm607_vm2, %v2471_v53, %v586_v49  ;;  %v1689_v62 = vsel %vm648_vm3, %v2470_v54, %v629_v50  ;;  %v1695_v2 = vpop.f32.mrb[2].mxu0  ;;  %v788_v23 = vmul.f32 %v1672_v58, %v1668_v56  ;;  %v1750_v24 = vmul.f32 %v1672_v58, %v1703_v6 }
 0x103   : > { %2494 = vst [vmem:[#allocation7_spill] sm:$0xff] %v1689_v62  ;;  %v1705_v7 = vpop.f32.mrb[3].mxu0  ;;  %v742_v8 = vmul.f32 %v1661_v52, %v626_v61  ;;  %v2477_v13 = vrot.slane %v1695_v2, 7  ;;  %v1717_v14 = vpop.f32.mrb[2].mxu1  ;;  %v616_v15 = vsel %vm607_vm2, %v2473_v10, %v596_v63  ;;  %v657_v16 = vsel %vm648_vm3, %v2472_v11, %v639_v0  ;;  %2496 = vst [vmem:[#allocation9_spill] sm:$0xff] %v1740_v21 }
 0x104   : > { %2495 = vst [vmem:[#allocation8_spill] sm:$0xff] %v1705_v7  ;;  %v2474_v17 = vrot.slane %v1695_v2, 1  ;;  %v722_v18 = vmul.f32 %v1695_v2, %v1674_v59  ;;  %v1734_v19 = vpop.f32.mrb[3].mxu1  ;;  %2497 = vst [vmem:[#allocation10_spill] sm:$0xff] %v1750_v24  ;;  %v1756_v26 = vmul.f32 %v1674_v59, %v1693_v1  ;;  %v587_v28 = vrot.slane %v1705_v7, 7 }
 0x105   : > { %v630_v29 = vrot.slane %v1705_v7, 1  ;;  %v1762_v30 = vmul.f32 %v1668_v56, %v1693_v1  ;;  %v1765_v31 = vmul.f32 %v1670_v57, %v657_v16  ;;  %v1769_v32 = vmul.f32 %v1703_v6, %v1693_v1 }
 0x106   : > { %v1736_v20 = vpop.f32.mrb[4].mxu0  ;;  %v758_v27 = vadd.f32 %v742_v8, %v722_v18  ;;  %v1773_v33 = vmul.f32 %v1695_v2, %v1668_v56  ;;  %v624_v36 = vsel %vm607_vm2, %v587_v28, %v2477_v13  ;;  %v625_v37 = vsel %vm607_vm2, %v586_v49, %v587_v28 }
 0x107   : > { %v1752_v25 = vpop.f32.mrb[5].mxu0  ;;  %2499 = vst [vmem:[#allocation12_spill] sm:$0xff] %v1769_v32  ;;  %v1775_v34 = vpop.f32.mrb[4].mxu1  ;;  %v1787_v38 = vsel %vm648_vm3, %v630_v29, %v2474_v17  ;;  %v1794_v41 = vmul.f32 %v1697_v3, %v616_v15  ;;  %v1797_v43 = vmul.f32 %v1699_v4, %v657_v16  ;;  %v1800_v44 = vmul.f32 %v1701_v5, %v616_v15 }
 0x108   : > { %2498 = vst [vmem:[#allocation11_spill] sm:$0xff] %v1752_v25  ;;  %v794_v35 = vadd.f32 %v778_v12, %v758_v27  ;;  %2500 = vst [vmem:[#allocation13_spill] sm:$0xff] %v1787_v38  ;;  %v1789_v39 = vpop.f32.mrb[5].mxu1  ;;  %v666_v45 = vsel %vm648_vm3, %v629_v50, %v630_v29  ;;  %v1809_v48 = vmul.f32 %v1708_v9, %v657_v16  ;;  %v2475_v55 = vrot.slane %v1717_v14, 7 }
 0x109   : > { %2501 = vst [vmem:[#allocation14_spill] sm:$0xff] %v1794_v41  ;;  %2502 = vst [vmem:[#allocation15_spill] sm:$0xff] %v1797_v43  ;;  %v695_v49 = vsel %vm693_vm5, %v666_v45, 0.0  ;;  %v2476_v61 = vrot.slane %v1717_v14, 1  ;;  %v1817_v8 = vmul.f32 %v1668_v56, %v1705_v7  ;;  %v732_v50 = vmul.f32 %v1717_v14, %v1674_v59 }
 0x10a   : > { %v1791_v40 = vpop.f32.mrb[6].mxu0  ;;  %2503 = vst [vmem:[#allocation16_spill] sm:$0xff] %v1800_v44  ;;  %2504 = vst [vmem:[#allocation17_spill] sm:$0xff] %v1809_v48  ;;  %v814_v46 = vmul.f32 %v1670_v57, %v695_v49  ;;  %v752_v12 = vmul.f32 %v1661_v52, %v616_v15  ;;  %v1827_v18 = vsel %vm670_vm4, %v625_v37, 0.0  ;;  %v744_v27 = vmul.f32 %v1661_v52, %v624_v36 }
 0x10b   : > { %v1806_v47 = vpop.f32.mrb[7].mxu0  ;;  %v1823_v16 = vpop.f32.mrb[6].mxu1  ;;  %2505 = vst [vmem:[#allocation18_spill] sm:$0xff] %v1827_v18  ;;  %v597_v28 = vrot.slane %v1734_v19, 7  ;;  %v640_v29 = vrot.slane %v1734_v19, 1  ;;  %v815_v54 = vmul.f32 %v1670_v57, %v1787_v38  ;;  %v850_v53 = vmul.f32 %v1697_v3, %v624_v36 }
 0x10c   : > { %v1832_v45 = vpop.f32.mrb[7].mxu1  ;;  %v830_v15 = vadd.f32 %v814_v46, %v794_v35  ;;  %v768_v11 = vadd.f32 %v752_v12, %v732_v50  ;;  %v1869_v58 = vmul.f32 %v1717_v14, %v1668_v56  ;;  %v589_v62 = vrot.slane %v1752_v25, 7 }
 0x10d   : > { %v614_v37 = vsel %vm607_vm2, %v597_v28, %v2475_v55  ;;  %v615_v17 = vsel %vm607_vm2, %v596_v63, %v597_v28  ;;  %v655_v35 = vsel %vm648_vm3, %v640_v29, %v2476_v61  ;;  %v656_v36 = vsel %vm648_vm3, %v639_v0, %v640_v29 }
 0x10e   : > { %v1834_v49 = vpop.f32.mrb[8].mxu0  ;;  %v866_v46 = vadd.f32 %v850_v53, %v830_v15  ;;  %v804_v50 = vadd.f32 %v788_v23, %v768_v11  ;;  %v1859_v12 = vsel %vm670_vm4, %v615_v17, 0.0  ;;  %v705_v55 = vsel %vm693_vm5, %v656_v36, 0.0 }
 0x10f   : > { %v1839_v10 = vpop.f32.mrb[9].mxu0  ;;  %v1863_v63 = vpop.f32.mrb[8].mxu1  ;;  %v743_v28 = vmul.f32 %v1661_v52, %v1827_v18  ;;  %v1873_v53 = vmul.f32 %v1717_v14, %v1703_v6  ;;  %v824_v0 = vmul.f32 %v1670_v57, %v705_v55  ;;  %v1880_v17 = vmul.f32 %v1674_v59, %v1734_v19  ;;  %v2571_v42 = vld [vmem:[#allocation13_spill] sm:$0xff] }
 0x110   : > { %2506 = vst [vmem:[#allocation19_spill] sm:$0xff] %v1863_v63  ;;  %v1876_v11 = vpop.f32.mrb[9].mxu1  ;;  %v1884_v23 = vmul.f32 %v1668_v56, %v1734_v19  ;;  %v1887_v29 = vmul.f32 %v1670_v57, %v655_v35  ;;  %v1891_v15 = vmul.f32 %v1697_v3, %v1859_v12  ;;  %v860_v61 = vmul.f32 %v1697_v3, %v614_v37 }
 0x111   : > { %2507 = vst [vmem:[#allocation20_spill] sm:$0xff] %v1873_v53  ;;  %2508 = vst [vmem:[#allocation21_spill] sm:$0xff] %v1876_v11  ;;  %v840_v36 = vadd.f32 %v824_v0, %v804_v50  ;;  %v1895_v13 = vmul.f32 %v1699_v4, %v705_v55  ;;  %v1898_v38 = vmul.f32 %v1699_v4, %v655_v35  ;;  %v632_v51 = vrot.slane %v1752_v25, 1 }
 0x112   : > { %v1902_v18 = vmul.f32 %v1701_v5, %v1859_v12  ;;  %v724_v11 = vmul.f32 %v1736_v20, %v1674_v59  ;;  %v1911_v0 = vmul.f32 %v1701_v5, %v614_v37  ;;  %v1917_v63 = vmul.f32 %v1703_v6, %v1734_v19 }
 0x113   : > { %2509 = vst [vmem:[#allocation22_spill] sm:$0xff] %v1895_v13  ;;  %2510 = vst [vmem:[#allocation23_spill] sm:$0xff] %v1898_v38  ;;  %v1908_v50 = vadd.f32 %v860_v61, %v840_v36  ;;  %v1920_v21 = vmul.f32 %v1708_v9, %v705_v55  ;;  %v723_v48 = vmul.f32 %v1674_v59, %v1752_v25  ;;  %v2515_v61 = vrot.slane %v1736_v20, 7 }
 0x114   : > { %2511 = vst [vmem:[#allocation24_spill] sm:$0xff] %v1902_v18  ;;  %2512 = vst [vmem:[#allocation25_spill] sm:$0xff] %v1911_v0  ;;  %v760_v7 = vadd.f32 %v744_v27, %v724_v11  ;;  %v2516_v53 = vrot.slane %v1695_v2, 7  ;;  %v2517_v19 = vrot.slane %v1736_v20, 1  ;;  %v2519_v27 = vrot.slane %v1695_v2, 1 }
 0x115   : > { %2513 = vst [vmem:[#allocation26_spill] sm:$0xff] %v1917_v63  ;;  %2514 = vst [vmem:[#allocation27_spill] sm:$0xff] %v1920_v21  ;;  %v622_v36 = vsel %vm607_vm2, %v589_v62, %v2515_v61  ;;  %v1950_v63 = vmul.f32 %v1708_v9, %v655_v35  ;;  %v958_v2 = vmul.f32 %v1736_v20, %v1703_v6  ;;  %v634_v43 = vrot.slane %v1806_v47, 1 }
 0x116   : > { %v623_v32 = vsel %vm607_vm2, %v2516_v53, %v589_v62  ;;  %v1936_v55 = vsel %vm648_vm3, %v632_v51, %v2517_v19  ;;  %v664_v11 = vsel %vm648_vm3, %v2519_v27, %v632_v51  ;;  %v796_v21 = vadd.f32 %v1773_v33, %v760_v7 }
 0x117   : > { %2518 = vst [vmem:[#allocation28_spill] sm:$0xff] %v1936_v55  ;;  %v1945_v61 = vsel %vm670_vm4, %v623_v32, 0.0  ;;  %v697_v62 = vsel %vm693_vm5, %v664_v11, 0.0  ;;  %v759_v53 = vadd.f32 %v743_v28, %v723_v48  ;;  %2521 = vst [vmem:[#allocation30_spill] sm:$0xff] %v1950_v63  ;;  %v782_v19 = vmul.f32 %v1736_v20, %v1668_v56 }
 0x118   : > { %2520 = vst [vmem:[#allocation29_spill] sm:$0xff] %v1945_v61  ;;  %v816_v51 = vmul.f32 %v1670_v57, %v697_v62  ;;  %v781_v7 = vmul.f32 %v1668_v56, %v1752_v25  ;;  %v1962_v33 = vmul.f32 %v1670_v57, %v1936_v55  ;;  %v886_v48 = vmul.f32 %v1699_v4, %v697_v62 }
 0x119   : > { %v795_v32 = vadd.f32 %v1817_v8, %v759_v53  ;;  %v851_v28 = vmul.f32 %v1697_v3, %v1945_v61  ;;  %v852_v27 = vmul.f32 %v1697_v3, %v622_v36  ;;  %v922_v11 = vmul.f32 %v1701_v5, %v622_v36 }
 0x11a   : > { %v832_v35 = vadd.f32 %v816_v51, %v796_v21  ;;  %v902_v18 = vadd.f32 %v886_v48, %v866_v46  ;;  %v2486_v25 = vrot.slane %v1775_v34, 1  ;;  %v734_v8 = vmul.f32 %v1775_v34, %v1674_v59 }
 0x11b   : > { %v831_v63 = vadd.f32 %v815_v54, %v795_v32  ;;  %v887_v24 = vmul.f32 %v1699_v4, %v1936_v55  ;;  %v754_v62 = vmul.f32 %v1661_v52, %v614_v37  ;;  %v1978_v0 = vmul.f32 %v1775_v34, %v1668_v56 }
 0x11c   : > { %v868_v53 = vadd.f32 %v852_v27, %v832_v35  ;;  %v938_v51 = vadd.f32 %v922_v11, %v902_v18  ;;  %v642_v54 = vrot.slane %v1789_v39, 1  ;;  %v733_v46 = vmul.f32 %v1674_v59, %v1789_v39 }
 0x11d   : > { %v770_v32 = vadd.f32 %v754_v62, %v734_v8  ;;  %v1985_v48 = vmul.f32 %v1775_v34, %v1703_v6  ;;  %v753_v37 = vmul.f32 %v1661_v52, %v1859_v12  ;;  %v2522_v11 = vrot.slane %v1717_v14, 1 }
 0x11e   : > { %v974_v18 = vadd.f32 %v958_v2, %v938_v51  ;;  %v1994_v27 = vsel %vm648_vm3, %v642_v54, %v2486_v25  ;;  %v2002_v62 = vmul.f32 %v1668_v56, %v1789_v39  ;;  %v2009_v51 = vmul.f32 %v1703_v6, %v1789_v39 }
 0x11f   : > { %v654_v8 = vsel %vm648_vm3, %v2522_v11, %v642_v54  ;;  %v806_v35 = vadd.f32 %v1869_v58, %v770_v32  ;;  %v769_v2 = vadd.f32 %v753_v37, %v733_v46  ;;  %v2014_v21 = vmul.f32 %v1708_v9, %v1994_v27 }
 0x120   : > { %v707_v12 = vsel %vm693_vm5, %v654_v8, 0.0  ;;  %2523 = vst [vmem:[#allocation31_spill] sm:$0xff] %v2009_v51  ;;  %v726_v46 = vmul.f32 %v1791_v40, %v1674_v59  ;;  %v746_v37 = vmul.f32 %v1661_v52, %v622_v36  ;;  %v591_v55 = vrot.slane %v1806_v47, 7 }
 0x121   : > { %v826_v25 = vmul.f32 %v1670_v57, %v707_v12  ;;  %2524 = vst [vmem:[#allocation32_spill] sm:$0xff] %v2014_v21  ;;  %v805_v58 = vadd.f32 %v1884_v23, %v769_v2  ;;  %v896_v32 = vmul.f32 %v1699_v4, %v707_v12  ;;  %v2024_v8 = vmul.f32 %v1708_v9, %v707_v12 }
 0x122   : > { %v725_v54 = vmul.f32 %v1674_v59, %v1806_v47  ;;  %v762_v23 = vadd.f32 %v746_v37, %v726_v46  ;;  %v2035_v2 = vmul.f32 %v1791_v40, %v1668_v56  ;;  %v745_v36 = vmul.f32 %v1661_v52, %v1945_v61 }
 0x123   : > { %2525 = vst [vmem:[#allocation33_spill] sm:$0xff] %v2024_v8  ;;  %v2031_v11 = vadd.f32 %v1887_v29, %v805_v58  ;;  %v2526_v12 = vrot.slane %v1791_v40, 7  ;;  %v2527_v44 = vrot.slane %v1736_v20, 7  ;;  %v2528_v58 = vrot.slane %v1791_v40, 1 }
 0x124   : > { %v2529_v37 = vrot.slane %v1736_v20, 1  ;;  %v798_v13 = vadd.f32 %v782_v19, %v762_v23  ;;  %v867_v41 = vadd.f32 %v851_v28, %v831_v63  ;;  %v842_v51 = vadd.f32 %v826_v25, %v806_v35 }
 0x125   : > { %v2043_v8 = vsel %vm607_vm2, %v591_v55, %v2526_v12  ;;  %v621_v29 = vsel %vm607_vm2, %v2527_v44, %v591_v55  ;;  %v2053_v46 = vsel %vm648_vm3, %v634_v43, %v2528_v58  ;;  %v761_v44 = vadd.f32 %v745_v36, %v725_v54 }
 0x126   : > { %v662_v61 = vsel %vm648_vm3, %v2529_v37, %v634_v43  ;;  %v2061_v12 = vsel %vm670_vm4, %v621_v29, 0.0  ;;  %v2067_v55 = vmul.f32 %v1791_v40, %v1703_v6  ;;  %v854_v19 = vmul.f32 %v1697_v3, %v2043_v8 }
 0x127   : > { %v699_v21 = vsel %vm693_vm5, %v662_v61, 0.0  ;;  %v797_v43 = vadd.f32 %v781_v7, %v761_v44  ;;  %v923_v23 = vmul.f32 %v1701_v5, %v2061_v12  ;;  %v924_v61 = vmul.f32 %v1701_v5, %v2043_v8  ;;  %v2089_v44 = vld [vmem:[%s2468_s4] ss:$0 sm:$0xff] }
 0x128   : > { %2530 = vst [vmem:[#allocation34_spill] sm:$0xff] %v2067_v55  ;;  %v818_v58 = vmul.f32 %v1670_v57, %v699_v21  ;;  %v888_v20 = vmul.f32 %v1699_v4, %v699_v21  ;;  %v903_v36 = vadd.f32 %v887_v24, %v867_v41  ;;  %v994_v37 = vmul.f32 %v1708_v9, %v699_v21 }
 0x129   : > { %v2080_v63 = vadd.f32 %v1962_v33, %v797_v43  ;;  %v959_v7 = vmul.f32 %v1703_v6, %v1806_v47  ;;  %v995_v28 = vmul.f32 %v1708_v9, %v2053_v46  ;;  %v2533_v24 = vrot.slane %v1789_v39, 7 }
 0x12a   : > { %v834_v54 = vadd.f32 %v818_v58, %v798_v13  ;;  %v904_v29 = vadd.f32 %v888_v20, %v868_v53  ;;  %v2532_v13 = vrot.slane %v1775_v34, 7  ;;  %v939_v53 = vadd.f32 %v923_v23, %v903_v36 }
 0x12b   : > { %2531 = vst [vmem:[#allocation35_spill] sm:$0xff] %v2080_v63  ;;  %v1010_v58 = vadd.f32 %v994_v37, %v974_v18  ;;  %v2490_v20 = vrot.slane %v1823_v16, 7  ;;  %v736_v43 = vmul.f32 %v1823_v16, %v1674_v59  ;;  %v2489_v23 = vrot.slane %v1823_v16, 1 }
 0x12c   : > { %v612_v41 = vsel %vm607_vm2, %v2533_v24, %v2532_v13  ;;  %v2099_v33 = vadd.f32 %v854_v19, %v834_v54  ;;  %v2101_v21 = vadd.f32 %v924_v61, %v904_v29  ;;  %v975_v63 = vadd.f32 %v959_v7, %v939_v53 }
 0x12d   : > { %v756_v55 = vmul.f32 %v1661_v52, %v612_v41  ;;  %v1033_v38 = vadd.f32 %v2089_v44, %v1010_v58  ;;  %v862_v13 = vmul.f32 %v1697_v3, %v612_v41  ;;  %v912_v19 = vadd.f32 %v896_v32, %v1908_v50 }
 0x12e   : > { %v932_v18 = vmul.f32 %v1701_v5, %v612_v41  ;;  %v601_v54 = vrot.slane %v1832_v45, 7  ;;  %v1011_v36 = vadd.f32 %v995_v28, %v975_v63  ;;  %v2534_v25 = vrot.slane %v1717_v14, 7 }
 0x12f   : > { %v772_v61 = vadd.f32 %v756_v55, %v736_v43  ;;  %v1049_v29 = vmax.f32 %v1033_v38, 0.0  ;;  %v878_v37 = vadd.f32 %v862_v13, %v842_v51  ;;  %v2535_v38 = vrot.slane %v1775_v34, 7 }
 0x130   : > { %v613_v35 = vsel %vm607_vm2, %v2534_v25, %v2533_v24  ;;  %v948_v50 = vadd.f32 %v932_v18, %v912_v19  ;;  %v2126_v32 = vsel %vm607_vm2, %v601_v54, %v2490_v20  ;;  %v2134_v14 = vmul.f32 %v1668_v56, %v1806_v47 }
 0x131   : > { %v2120_v7 = vadd.f32 %v1978_v0, %v772_v61  ;;  %v611_v39 = vsel %vm607_vm2, %v2535_v38, %v601_v54  ;;  %v1034_v51 = vadd.f32 %v2089_v44, %v1011_v36  ;;  %1065 = vst [vmem:[%s2137_s16 + $0x8] sm:$0xff] %v1049_v29  ;;  %v644_v0 = vrot.slane %v1832_v45, 1 }
 0x132   : > { %v686_v55 = vsel %vm670_vm4, %v613_v35, 0.0  ;;  %v2145_v63 = vsel %vm670_vm4, %v611_v39, 0.0  ;;  %v735_v47 = vmul.f32 %v1674_v59, %v1832_v45  ;;  %v2536_v43 = vrot.slane %v1775_v34, 1 }
 0x133   : > { %v755_v28 = vmul.f32 %v1661_v52, %v686_v55  ;;  %v861_v41 = vmul.f32 %v1697_v3, %v686_v55  ;;  %v1050_v53 = vmax.f32 %v1034_v51, 0.0  ;;  %v2155_v58 = vsel %vm648_vm3, %v644_v0, %v2489_v23 }
 0x134   : > { %v652_v13 = vsel %vm648_vm3, %v2536_v43, %v644_v0  ;;  %v897_v19 = vmul.f32 %v1699_v4, %v1994_v27  ;;  %v2167_v36 = vmul.f32 %v1701_v5, %v686_v55  ;;  %v933_v24 = vmul.f32 %v1701_v5, %v2145_v63 }
 0x135   : > { %v709_v61 = vsel %vm693_vm5, %v652_v13, 0.0  ;;  %v771_v18 = vadd.f32 %v755_v28, %v735_v47  ;;  %v877_v54 = vadd.f32 %v861_v41, %v2031_v11  ;;  %1066 = vst [vmem:[%s2137_s16 + $0x10] sm:$0xff] %v1050_v53  ;;  %v934_v25 = vmul.f32 %v1701_v5, %v2126_v32 }
 0x136   : > { %v2171_v29 = vmul.f32 %v1670_v57, %v709_v61  ;;  %v898_v34 = vmul.f32 %v1699_v4, %v709_v61  ;;  %v969_v11 = vmul.f32 %v1703_v6, %v1832_v45  ;;  %v984_v39 = vadd.f32 %v1985_v48, %v948_v50 }
 0x137   : > { %v2179_v35 = vadd.f32 %v2002_v62, %v771_v18  ;;  %v913_v38 = vadd.f32 %v897_v19, %v877_v54  ;;  %v1004_v0 = vmul.f32 %v1708_v9, %v709_v61  ;;  %v1005_v55 = vmul.f32 %v1708_v9, %v2155_v58 }
 0x138   : > { %v914_v51 = vadd.f32 %v898_v34, %v878_v37  ;;  %v594_v47 = vrot.slane %v1834_v49, 7  ;;  %v637_v41 = vrot.slane %v1834_v49, 1  ;;  %v728_v62 = vmul.f32 %v1834_v49, %v1674_v59 }
 0x139   : > { %v949_v28 = vadd.f32 %v933_v24, %v913_v38  ;;  %v748_v53 = vmul.f32 %v1661_v52, %v2043_v8  ;;  %v1020_v48 = vadd.f32 %v1004_v0, %v984_v39  ;;  %v2537_v37 = vrot.slane %v1693_v1, 7 }
 0x13a   : > { %v2193_v45 = vadd.f32 %v934_v25, %v914_v51  ;;  %v786_v43 = vmul.f32 %v1834_v49, %v1668_v56  ;;  %v2538_v19 = vrot.slane %v1693_v1, 1 }
 0x13b   : > { %v617_v50 = vsel %vm607_vm2, %v594_v47, %v2537_v37  ;;  %v985_v13 = vadd.f32 %v969_v11, %v949_v28  ;;  %v764_v18 = vadd.f32 %v748_v53, %v728_v62  ;;  %v1043_v54 = vadd.f32 %v2089_v44, %v1020_v48 }
 0x13c   : > { %v658_v61 = vsel %vm648_vm3, %v637_v41, %v2538_v19  ;;  %v682_v8 = vsel %vm670_vm4, %v617_v50, 0.0  ;;  %v2220_v28 = vmul.f32 %v1834_v49, %v1703_v6  ;;  %v727_v48 = vmul.f32 %v1674_v59, %v1839_v10 }
 0x13d   : > { %v703_v34 = vsel %vm693_vm5, %v658_v61, 0.0  ;;  %v751_v24 = vmul.f32 %v1661_v52, %v682_v8  ;;  %v2212_v25 = vmul.f32 %v1701_v5, %v682_v8  ;;  %v1021_v38 = vadd.f32 %v1005_v55, %v985_v13 }
 0x13e   : > { %v800_v1 = vadd.f32 %v2035_v2, %v764_v18  ;;  %v822_v11 = vmul.f32 %v1670_v57, %v703_v34  ;;  %v892_v39 = vmul.f32 %v1699_v4, %v703_v34  ;;  %v1059_v51 = vmax.f32 %v1043_v54, 0.0 }
 0x13f   : > { %v767_v0 = vadd.f32 %v751_v24, %v1880_v17  ;;  %v2223_v62 = vmul.f32 %v1708_v9, %v703_v34  ;;  %v1044_v53 = vadd.f32 %v2089_v44, %v1021_v38  ;;  %v593_v55 = vrot.slane %v1839_v10, 7 }
 0x140   : > { %v636_v2 = vrot.slane %v1839_v10, 1  ;;  %1075 = vst [vmem:[%s2137_s16 + $0x58] sm:$0xff] %v1059_v51  ;;  %v747_v49 = vmul.f32 %v1661_v52, %v2061_v12  ;;  %v785_v37 = vmul.f32 %v1668_v56, %v1839_v10  ;;  %v819_v50 = vmul.f32 %v1670_v57, %v2053_v46 }
 0x141   : > { %v803_v17 = vadd.f32 %v1762_v30, %v767_v0  ;;  %v1060_v13 = vmax.f32 %v1044_v53, 0.0  ;;  %v618_v19 = vsel %vm607_vm2, %v593_v55, %v594_v47  ;;  %v2539_v61 = vrot.slane %v1791_v40, 7 }
 0x142   : > { %v659_v30 = vsel %vm648_vm3, %v636_v2, %v637_v41  ;;  %v2540_v34 = vrot.slane %v1791_v40, 1  ;;  %v750_v47 = vmul.f32 %v1661_v52, %v618_v19  ;;  %v763_v0 = vadd.f32 %v747_v49, %v727_v48  ;;  %v2541_v48 = vld [vmem:[#allocation23_spill] sm:$0xff] }
 0x143   : > { %v619_v18 = vsel %vm607_vm2, %v2539_v61, %v593_v55  ;;  %v839_v54 = vadd.f32 %v1765_v31, %v803_v17  ;;  %1076 = vst [vmem:[%s2137_s16 + $0x60] sm:$0xff] %v1060_v13  ;;  %v821_v41 = vmul.f32 %v1670_v57, %v659_v30  ;;  %v853_v55 = vmul.f32 %v1697_v3, %v2061_v12 }
 0x144   : > { %v660_v56 = vsel %vm648_vm3, %v2540_v34, %v636_v2  ;;  %v680_v24 = vsel %vm670_vm4, %v619_v18, 0.0  ;;  %v766_v40 = vadd.f32 %v750_v47, %v1744_v22  ;;  %v799_v17 = vadd.f32 %v2134_v14, %v763_v0 }
 0x145   : > { %v701_v38 = vsel %vm693_vm5, %v660_v56, 0.0  ;;  %v749_v51 = vmul.f32 %v1661_v52, %v680_v24  ;;  %v875_v31 = vadd.f32 %v1891_v15, %v839_v54  ;;  %v855_v13 = vmul.f32 %v1697_v3, %v680_v24  ;;  %v2542_v56 = vld [vmem:[#allocation35_spill] sm:$0xff] }
 0x146   : > { %v820_v53 = vmul.f32 %v1670_v57, %v701_v38  ;;  %v856_v61 = vmul.f32 %v1697_v3, %v618_v19  ;;  %v802_v18 = vadd.f32 %v786_v43, %v766_v40  ;;  %v857_v15 = vmul.f32 %v1697_v3, %v682_v8 }
 0x147   : > { %v765_v2 = vadd.f32 %v749_v51, %v1756_v26  ;;  %v911_v49 = vadd.f32 %v2541_v48, %v875_v31  ;;  %v835_v54 = vadd.f32 %v819_v50, %v799_v17  ;;  %v869_v47 = vadd.f32 %v853_v55, %v2542_v56  ;;  %v2543_v31 = vld [vmem:[#allocation31_spill] sm:$0xff] }
 0x148   : > { %v836_v34 = vadd.f32 %v820_v53, %v800_v1  ;;  %v889_v12 = vmul.f32 %v1699_v4, %v2053_v46  ;;  %v838_v14 = vadd.f32 %v822_v11, %v802_v18  ;;  %v890_v0 = vmul.f32 %v1699_v4, %v701_v38  ;;  %v2548_v18 = vld [vmem:[#allocation15_spill] sm:$0xff] }
 0x149   : > { %v801_v22 = vadd.f32 %v785_v37, %v765_v2  ;;  %v947_v26 = vadd.f32 %v2167_v36, %v911_v49  ;;  %v871_v20 = vadd.f32 %v855_v13, %v835_v54  ;;  %v891_v43 = vmul.f32 %v1699_v4, %v659_v30  ;;  %v2544_v37 = vld [vmem:[#allocation14_spill] sm:$0xff]  ;;  %v2545_v2 = vld [vmem:[#allocation32_spill] sm:$0xff] }
 0x14a   : > { %v872_v51 = vadd.f32 %v856_v61, %v836_v34  ;;  %v905_v1 = vadd.f32 %v889_v12, %v869_v47  ;;  %v874_v50 = vadd.f32 %v2544_v37, %v838_v14  ;;  %v906_v40 = vadd.f32 %v890_v0, %v2099_v33  ;;  %v2547_v61 = vld [vmem:[#allocation16_spill] sm:$0xff]  ;;  %v2551_v54 = vld [vmem:[#allocation10_spill] sm:$0xff] }
 0x14b   : > { %v837_v23 = vadd.f32 %v821_v41, %v801_v22  ;;  %v983_v8 = vadd.f32 %v2543_v31, %v947_v26  ;;  %v907_v46 = vadd.f32 %v891_v43, %v871_v20  ;;  %v925_v36 = vmul.f32 %v1701_v5, %v680_v24  ;;  %v2546_v41 = vld [vmem:[#allocation22_spill] sm:$0xff]  ;;  %v2552_v47 = vld [vmem:[#allocation24_spill] sm:$0xff] }
 0x14c   : > { %v908_v53 = vadd.f32 %v892_v39, %v872_v51  ;;  %v926_v11 = vmul.f32 %v1701_v5, %v618_v19  ;;  %v910_v13 = vadd.f32 %v2546_v41, %v874_v50  ;;  %v961_v49 = vmul.f32 %v1703_v6, %v1839_v10  ;;  %v2549_v39 = vld [vmem:[#allocation25_spill] sm:$0xff]  ;;  %v2550_v24 = vld [vmem:[#allocation34_spill] sm:$0xff]  ;;  %v2553_v14 = vld [vmem:[#allocation12_spill] sm:$0xff] }
 0x14d   : > { %v873_v55 = vadd.f32 %v857_v15, %v837_v23  ;;  %v1019_v17 = vadd.f32 %v2545_v2, %v983_v8  ;;  %v941_v22 = vadd.f32 %v925_v36, %v905_v1  ;;  %v943_v23 = vadd.f32 %v2212_v25, %v907_v46  ;;  %v2554_v43 = vld [vmem:[#allocation20_spill] sm:$0xff]  ;;  %v2555_v8 = vld [vmem:[#allocation26_spill] sm:$0xff]  ;;  %v2556_v50 = vld [vmem:[#allocation17_spill] sm:$0xff] }
 0x14e   : > { %v944_v48 = vadd.f32 %v2547_v61, %v908_v53  ;;  %v942_v33 = vadd.f32 %v926_v11, %v906_v40  ;;  %v946_v19 = vadd.f32 %v2549_v39, %v910_v13  ;;  %v976_v15 = vadd.f32 %v2550_v24, %v2101_v21  ;;  %v2557_v53 = vld [vmem:[#allocation27_spill] sm:$0xff]  ;;  %v2558_v36 = vld [vmem:[#allocation33_spill] sm:$0xff]  ;;  %v2560_v41 = vld [vmem:[#allocation30_spill] sm:$0xff] }
 0x14f   : > { %v909_v34 = vadd.f32 %v2548_v18, %v873_v55  ;;  %v1042_v20 = vadd.f32 %v2089_v44, %v1019_v17  ;;  %v977_v26 = vadd.f32 %v961_v49, %v941_v22  ;;  %v979_v51 = vadd.f32 %v2553_v14, %v943_v23  ;;  %v2559_v2 = vld [vmem:[#allocation19_spill] sm:$0xff]  ;;  %v2561_v18 = vld [vmem:[#allocation6_spill] sm:$0xff] }
 0x150   : > { %v980_v56 = vadd.f32 %v2551_v54, %v944_v48  ;;  %v978_v10 = vadd.f32 %v2220_v28, %v942_v33  ;;  %v982_v25 = vadd.f32 %v2554_v43, %v946_v19  ;;  %v996_v1 = vmul.f32 %v1708_v9, %v701_v38 }
 0x151   : > { %v945_v12 = vadd.f32 %v2552_v47, %v909_v34  ;;  %v1058_v0 = vmax.f32 %v1042_v20, 0.0  ;;  %v997_v31 = vmul.f32 %v1708_v9, %v659_v30  ;;  %v1015_v40 = vadd.f32 %v2556_v50, %v979_v51  ;;  %v2565_v51 = vld [vmem:[#allocation8_spill] sm:$0xff] }
 0x152   : > { %v1014_v21 = vadd.f32 %v2223_v62, %v978_v10  ;;  %v1016_v55 = vadd.f32 %v2557_v53, %v980_v56  ;;  %v1012_v46 = vadd.f32 %v996_v1, %v976_v15  ;;  %v1018_v11 = vadd.f32 %v2558_v36, %v982_v25  ;;  %v2563_v56 = vld [vmem:[#allocation7_spill] sm:$0xff]  ;;  %v2564_v10 = vld [vmem:[#allocation21_spill] sm:$0xff] }
 0x153   : > { %v981_v37 = vadd.f32 %v2555_v8, %v945_v12  ;;  %1074 = vst [vmem:[%s2137_s16 + $0x50] sm:$0xff] %v1058_v0  ;;  %v1013_v28 = vadd.f32 %v997_v31, %v977_v26  ;;  %v604_v17 = vrot.slane %v2559_v2, 7  ;;  %v1038_v30 = vadd.f32 %v2089_v44, %v1015_v40 }
 0x154   : > { %v1037_v38 = vadd.f32 %v2089_v44, %v1014_v21  ;;  %v1039_v62 = vadd.f32 %v2089_v44, %v1016_v55  ;;  %v1035_v61 = vadd.f32 %v2089_v44, %v1012_v46  ;;  %v1041_v49 = vadd.f32 %v2089_v44, %v1018_v11 }
 0x155   : > { %v1017_v13 = vadd.f32 %v2560_v41, %v981_v37  ;;  %v1036_v48 = vadd.f32 %v2089_v44, %v1013_v28  ;;  %v2562_v34 = vrot.slane %v2561_v18, 7  ;;  %v1054_v20 = vmax.f32 %v1038_v30, 0.0  ;;  %v2570_v41 = vld [vmem:[#allocation18_spill] sm:$0xff] }
 0x156   : > { %v1053_v23 = vmax.f32 %v1037_v38, 0.0  ;;  %v1055_v39 = vmax.f32 %v1039_v62, 0.0  ;;  %v1051_v19 = vmax.f32 %v1035_v61, 0.0  ;;  %v1057_v15 = vmax.f32 %v1041_v49, 0.0 }
 0x157   : > { %v627_v22 = vsel %vm607_vm2, %v604_v17, %v2562_v34  ;;  %v1040_v33 = vadd.f32 %v2089_v44, %v1017_v13  ;;  %v1052_v24 = vmax.f32 %v1036_v48, 0.0  ;;  %v647_v54 = vrot.slane %v2559_v2, 1  ;;  %1070 = vst [vmem:[%s2137_s16 + $0x30] sm:$0xff] %v1054_v20 }
 0x158   : > { %v813_v47 = vmul.f32 %v1670_v57, %v2563_v56  ;;  %1069 = vst [vmem:[%s2137_s16 + $0x28] sm:$0xff] %v1053_v23  ;;  %1071 = vst [vmem:[%s2137_s16 + $0x38] sm:$0xff] %v1055_v39  ;;  %v672_v26 = vsel %vm670_vm4, %v627_v22, 0.0  ;;  %v603_v14 = vrot.slane %v2564_v10, 7  ;;  %v721_v0 = vmul.f32 %v1674_v59, %v2565_v51 }
 0x159   : > { %v1056_v12 = vmax.f32 %v1040_v33, 0.0  ;;  %1067 = vst [vmem:[%s2137_s16 + $0x18] sm:$0xff] %v1051_v19  ;;  %1068 = vst [vmem:[%s2137_s16 + $0x20] sm:$0xff] %v1052_v24  ;;  %v2566_v43 = vrot.slane %v2561_v18, 1  ;;  %v741_v1 = vmul.f32 %v1661_v52, %v672_v26  ;;  %v646_v31 = vrot.slane %v2564_v10, 1 }
 0x15a   : > { %1073 = vst [vmem:[%s2137_s16 + $0x48] sm:$0xff] %v1057_v15  ;;  %v608_v8 = vsel %vm607_vm2, %v603_v14, %v604_v17  ;;  %v2567_v37 = vrot.slane %v1823_v16, 7  ;;  %v827_v21 = vmul.f32 %v1670_v57, %v1994_v27  ;;  %v844_v50 = vadd.f32 %v2171_v29, %v2120_v7 }
 0x15b   : > { %v668_v25 = vsel %vm648_vm3, %v647_v54, %v2566_v43  ;;  %1072 = vst [vmem:[%s2137_s16 + $0x40] sm:$0xff] %v1056_v12  ;;  %v864_v52 = vmul.f32 %v1697_v3, %v2126_v32  ;;  %v757_v40 = vadd.f32 %v741_v1, %v721_v0  ;;  %v649_v53 = vsel %vm648_vm3, %v646_v31, %v647_v54  ;;  %v2569_v32 = vld [vmem:[#allocation9_spill] sm:$0xff]  ;;  %v2573_v54 = vld [vmem:[#allocation11_spill] sm:$0xff] }
 0x15c   : > { %v609_v59 = vsel %vm607_vm2, %v2567_v37, %v603_v14  ;;  %v2568_v55 = vrot.slane %v1823_v16, 1  ;;  %v970_v28 = vmul.f32 %v1823_v16, %v1703_v6  ;;  %v843_v27 = vadd.f32 %v827_v21, %v2179_v35 }
 0x15d   : > { %v863_v7 = vmul.f32 %v1697_v3, %v2145_v63  ;;  %v793_v29 = vadd.f32 %v2569_v32, %v757_v40  ;;  %v690_v36 = vsel %vm670_vm4, %v609_v59, 0.0  ;;  %v880_v11 = vadd.f32 %v864_v52, %v844_v50 }
 0x15e   : > { %v650_v46 = vsel %vm648_vm3, %v2568_v55, %v646_v31  ;;  %v849_v13 = vmul.f32 %v1697_v3, %v2570_v41  ;;  %v899_v38 = vmul.f32 %v1699_v4, %v2155_v58  ;;  %v936_v35 = vmul.f32 %v1701_v5, %v608_v8 }
 0x15f   : > { %v711_v57 = vsel %vm693_vm5, %v650_v46, 0.0  ;;  %v879_v16 = vadd.f32 %v863_v7, %v843_v27  ;;  %v829_v30 = vadd.f32 %v813_v47, %v793_v29  ;;  %v986_v63 = vadd.f32 %v970_v28, %v2193_v45  ;;  %v2572_v45 = vld [vmem:[#allocation29_spill] sm:$0xff] }
 0x160   : > { %v900_v17 = vmul.f32 %v1699_v4, %v711_v57  ;;  %v1006_v61 = vmul.f32 %v1708_v9, %v711_v57  ;;  %v885_v48 = vmul.f32 %v1699_v4, %v2571_v42  ;;  %v713_v3 = vsel %vm693_vm5, %v668_v25, 0.0 }
 0x161   : > { %v915_v49 = vadd.f32 %v899_v38, %v879_v16  ;;  %v935_v18 = vmul.f32 %v1701_v5, %v690_v36  ;;  %v865_v58 = vadd.f32 %v849_v13, %v829_v30  ;;  %v972_v34 = vmul.f32 %v2559_v2, %v1703_v6 }
 0x162   : > { %v916_v62 = vadd.f32 %v900_v17, %v880_v11  ;;  %v1022_v33 = vadd.f32 %v1006_v61, %v986_v63  ;;  %v921_v23 = vmul.f32 %v1701_v5, %v2572_v45  ;;  %v971_v4 = vmul.f32 %v1703_v6, %v2564_v10  ;;  %v2574_v10 = vld [vmem:[#allocation28_spill] sm:$0xff] }
 0x163   : > { %v951_v20 = vadd.f32 %v935_v18, %v915_v49  ;;  %v901_v39 = vadd.f32 %v885_v48, %v865_v58  ;;  %v1008_v60 = vmul.f32 %v1708_v9, %v713_v3  ;;  %v1007_v2 = vmul.f32 %v1708_v9, %v649_v53 }
 0x164   : > { %v952_v22 = vadd.f32 %v936_v35, %v916_v62  ;;  %v1045_v24 = vadd.f32 %v2089_v44, %v1022_v33  ;;  %v957_v5 = vmul.f32 %v1703_v6, %v2573_v54  ;;  %v993_v14 = vmul.f32 %v1708_v9, %v2574_v10 }
 0x165   : > { %v987_v15 = vadd.f32 %v971_v4, %v951_v20  ;;  %v937_v56 = vadd.f32 %v921_v23, %v901_v39 }
 0x166   : > { %v988_v19 = vadd.f32 %v972_v34, %v952_v22  ;;  %v1061_v12 = vmax.f32 %v1045_v24, 0.0 }
 0x167   : > { %v1023_v26 = vadd.f32 %v1007_v2, %v987_v15  ;;  %v973_v51 = vadd.f32 %v957_v5, %v937_v56 }
 0x168   : > { %v1024_v47 = vadd.f32 %v1008_v60, %v988_v19  ;;  %1077 = vst [vmem:[%s2137_s16 + $0x68] sm:$0xff] %v1061_v12 }
 0x169   : > { %v1046_v43 = vadd.f32 %v2089_v44, %v1023_v26  ;;  %v1009_v6 = vadd.f32 %v993_v14, %v973_v51 }
 0x16a   : > { %v1047_v0 = vadd.f32 %v2089_v44, %v1024_v47 }
 0x16b   : > { %v1062_v1 = vmax.f32 %v1046_v43, 0.0  ;;  %v1032_v31 = vadd.f32 %v2089_v44, %v1009_v6 }
 0x16c   : > { %v1063_v25 = vmax.f32 %v1047_v0, 0.0 }
 0x16d   : > { %1078 = vst [vmem:[%s2137_s16 + $0x70] sm:$0xff] %v1062_v1  ;;  %v1048_v9 = vmax.f32 %v1032_v31, 0.0 }
 0x16e   : > { %1079 = vst [vmem:[%s2137_s16 + $0x78] sm:$0xff] %v1063_v25 }
 0x16f   : > { %1064 = vst [vmem:[%s2137_s16] sm:$0xff] %v1048_v9 }
 0x170   : > { %1383 = shalt.err (!%p1380_p9)
}
 0x171   : > { %s1384_s10 = scalar_lea.hbm %s2405_s8, 2048  ;;  %s1388_s26 = scalar_lea.hbm %s2469_s5, 8192 }
 0x172   : > { %p1385_p10 = scmp.ne.s32.totalorder %s2405_s8, %s1384_s10  ;;  %p1389_p13 = scmp.lt.u32.totalorder %s2405_s8, %s2469_s5 }
 0x173   : > { %p1390_p0 = scmp.lt.u32.totalorder %s1388_s26, %s1384_s10  ;;  %p1392_p2 = scmp.lt.u32.totalorder %s1384_s10, %s2405_s8 }
 0x174   : > { %p1386_p11 = pnand %p1385_p10, %p1550_p3 }
 0x175   : > { %p1391_p1 = por %p1390_p0, %p1389_p13 }
 0x176   : > { %p1387_p12 = pneg %p1386_p11 }
 0x177   : > { %p1393_p4 = por %p1392_p2, %p1391_p1 }
 0x179   : > { %p1394_p5 = pnand %p1393_p4, %p1387_p12 }
 0x17b   : > { %1397 = shalt.err (!%p1394_p5)
}
 0x17c   : > { %s1467_s30 = smov 128   ;;  %s1468_s12 = smov 8  }
 0x17d   : > { %1297 = dma.vmem_to_hbm [thread:$0]  (%p1550_p3), %s2407_s22, 2048, %s2405_s8, %s2412_s9, %s1467_s30, %s1467_s30, %s1468_s12  }
 0x17e PF: > { %p1303_p6 = scmp.ge.s32.totalorder %s1464_s25, 2  ;;  %s1112_s13 = sand.u32 1, %s1436_s18  }
 0x17f   : > { %s1113_s14 = scalar_lea.sflag [#allocation4], %s1112_s13 }
 0x180   : > { %p1300_p7 = pnand %p1303_p6, %p1559_p8 }
 0x182   : > { %1431 = dma.done.wait (!%p1300_p7), %s1113_s14, 2048  }
 0x183   : > { %1433 = vsyncadd (!%p1300_p7), %s1113_s14, 4294965248  ;;  %s18_s25 = sadd.s32 1, %s1464_s25   ;;  %s2575_s18 = smov %s1440_s19 }
 0x184   : > { %p15_p9 = scmp.ge.s32.totalorder %s18_s25, 6   ;;  %s2576_s19 = smov %s1444_s20 }
 0x185   : > { %s2577_s20 = smov %s1568_s11  ;;  %s2578_s21 = smov %s1456_s23 }
 0x186   : > { %s2579_s22 = smov %s1460_s24  ;;  %s2580_s23 = smov %s2583_s28 }
 0x187   : > { %s2581_s24 = smov %s2587_s29  ;;  %17 = sbr.rel (!%p15_p9) target bundleno = 5 (0x5), region = 81 }
 0x18e   :  { %1118 = vsyncpa [#allocation4], 1 }
 0x18f   :  { %1120 = vsyncpa [#allocation4 + $0x1], 1 }

</bundles_post_ra>
